<compile_context>
chip_gen: v6e
topology: v6e:2x2x1
jax: 0.10.0
libtpu: 0.0.40
codegen_flags: <defaults>
</compile_context>

<pallas_src>
import functools

import jax
import jax.numpy as jnp
from jax.experimental import pallas as pl
from jax.experimental.pallas import tpu as pltpu


def _round_up(x, m):
    return ((x + m - 1) // m) * m


def _mlp_kernel(*refs, n_layers, apply_softmax, nc, approx_recip):
    """Fused MLP: [Linear -> ReLU]*(n_layers-1) -> Linear [-> masked Softmax].

    refs = (x_ref, W0, b0, W1, b1, ..., W_{L-1}, b_{L-1}, out_ref)

    x / W arrive in the MXU compute dtype (bf16 or f32); accumulation, bias add,
    ReLU and softmax run in f32.  The last layer's columns are zero-padded to a
    lane-dense width; padded columns are masked out of the softmax.
    """
    x_ref = refs[0]
    out_ref = refs[-1]
    wb_refs = refs[1:-1]

    mxu_dtype = x_ref.dtype
    h = x_ref[...]  # (tile_b, ld) in mxu_dtype
    for i in range(n_layers):
        w = wb_refs[2 * i][...]                          # (in, out) mxu_dtype
        b = wb_refs[2 * i + 1][...].astype(jnp.float32)  # (1, out) f32, broadcasts
        h = jnp.dot(h, w, preferred_element_type=jnp.float32) + b
        if i < n_layers - 1:
            h = jnp.maximum(h, 0.0)                      # ReLU in f32 (v5e-safe)
            if jnp.dtype(mxu_dtype) != jnp.dtype(jnp.float32):
                h = h.astype(mxu_dtype)                  # narrow only for the next MXU pass
            # Dropout(p) is identity in eval / inference mode.

    # h: (tile_b, nc_pad) f32; columns >= nc are exactly zero (zero-padded W/b).
    if apply_softmax:
        nc_pad = h.shape[-1]
        if nc_pad != nc:
            col = jax.lax.broadcasted_iota(jnp.int32, h.shape, 1)
            valid = col < nc
            h = jnp.where(valid, h, -jnp.inf)
        m = jnp.max(h, axis=-1, keepdims=True)
        e = jnp.exp(h - m)
        if nc_pad != nc:
            e = jnp.where(valid, e, 0.0)
        s = jnp.sum(e, axis=-1, keepdims=True)
        h = e * pl.reciprocal(s, approx=approx_recip)

    out_ref[...] = h.astype(out_ref.dtype)


def mlp_forward(x, params, *, apply_softmax=False, tile_b=256,
                mxu_dtype=jnp.bfloat16, approx_recip=None):
    """Run the fused MLP kernel.

    x: (B, latent_dim) float32
    params: list of (W, b); W: (in, out) [transpose of nn.Linear.weight], b: (1, out)
    mxu_dtype: matmul-operand dtype (bf16 recommended on v6e/v7x; f32 for bit-accurate
               checks).  Accumulation and elementwise math always stay f32.
    """
    B, ld = x.shape
    n_layers = len(params)
    nc = params[-1][0].shape[1]
    nc_pad = _round_up(nc, 128)  # lane-dense output block
    if approx_recip is None:
        approx_recip = (jnp.dtype(mxu_dtype) != jnp.dtype(jnp.float32))

    # Effective batch tile: never larger than the (8-rounded) batch itself.
    tile_b_eff = min(tile_b, _round_up(B, 8))
    b_pad = _round_up(B, tile_b_eff)

    # --- wrapper-side layout plumbing (free relative to the kernel) ----------
    xp = x.astype(mxu_dtype)
    if b_pad != B:
        xp = jnp.pad(xp, ((0, b_pad - B), (0, 0)))

    const_map = lambda i: (0, 0)   # weights/biases: one DMA, VMEM-resident
    flat_args = []
    in_specs = [pl.BlockSpec((tile_b_eff, ld), lambda i: (i, 0))]
    for li, (w, b) in enumerate(params):
        w = w.astype(mxu_dtype)
        b = b.astype(jnp.float32)
        if li == n_layers - 1 and nc_pad != nc:
            # Zero-pad the final layer to lane-dense output columns.
            w = jnp.pad(w, ((0, 0), (0, nc_pad - nc)))
            b = jnp.pad(b, ((0, 0), (0, nc_pad - nc)))
        in_specs.append(pl.BlockSpec(w.shape, const_map))
        in_specs.append(pl.BlockSpec(b.shape, const_map))
        flat_args.extend([w, b])

    out_spec = pl.BlockSpec((tile_b_eff, nc_pad), lambda i: (i, 0))
    grid = (pl.cdiv(b_pad, tile_b_eff),)

    kernel = functools.partial(
        _mlp_kernel,
        n_layers=n_layers,
        apply_softmax=apply_softmax,
        nc=nc,
        approx_recip=approx_recip,
    )

    out_padded = pl.pallas_call(
        kernel,
        out_shape=jax.ShapeDtypeStruct((b_pad, nc_pad), jnp.float32),
        grid_spec=pltpu.PrefetchScalarGridSpec(
            num_scalar_prefetch=0,
            grid=grid,
            in_specs=in_specs,
            out_specs=out_spec,
        ),
        compiler_params=pltpu.CompilerParams(
            dimension_semantics=("parallel",),
        ),
    )(xp, *flat_args)

    return out_padded[:B, :nc]


def init_mlp_params(key, layer_dims):
    """Deterministic PyTorch-style init: U(-1/sqrt(fan_in), 1/sqrt(fan_in))."""
    params = []
    for fan_in, fan_out in zip(layer_dims[:-1], layer_dims[1:]):
        key, kw, kb = jax.random.split(key, 3)
        bound = 1.0 / jnp.sqrt(float(fan_in))
        w = jax.random.uniform(
            kw, (fan_in, fan_out), jnp.float32, minval=-bound, maxval=bound
        )
        b = jax.random.uniform(
            kb, (1, fan_out), jnp.float32, minval=-bound, maxval=bound
        )
        params.append((w, b))
    return params


def mlp_reference(x, params, apply_softmax=False):
    """Plain-JAX f32 reference of the same forward pass."""
    h = x
    n = len(params)
    for i, (w, b) in enumerate(params):
        h = h @ w + b
        if i < n - 1:
            h = jnp.maximum(h, 0.0)
    if apply_softmax:
        h = jax.nn.softmax(h, axis=-1)
    return h


if __name__ == "__main__":
    # Module config:  N (layers) = 3, nuerons_info = [32, 32, 10], ld = 16
    #   -> F = [32, 32], nc = 10
    N_LAYERS = 3
    NEURONS_INFO = [32, 32, 10]
    LATENT_DIM = 16
    BATCH = 512            # 2 grid steps at tile_b=256 -> both v7x TensorCores used
    TILE_B = 256

    F = NEURONS_INFO[:-1]
    NC = NEURONS_INFO[-1]
    layer_dims = [LATENT_DIM] + F + [NC]

    key = jax.random.PRNGKey(0)
    key, kx = jax.random.split(key)
    x = jax.random.normal(kx, (BATCH, LATENT_DIM), jnp.float32)
    params = init_mlp_params(key, layer_dims)

    # 1) f32 MXU path, no softmax (module default): bit-tight check.
    out = jax.block_until_ready(
        mlp_forward(x, params, apply_softmax=False, tile_b=TILE_B,
                    mxu_dtype=jnp.float32)
    )
    ref = mlp_reference(x, params, apply_softmax=False)
    assert out.shape == (BATCH, NC)
    assert jnp.allclose(out, ref, atol=1e-5, rtol=1e-5)

    # 2) f32 MXU path with softmax (exact reciprocal, masked padded lanes).
    out_sm = jax.block_until_ready(
        mlp_forward(x, params, apply_softmax=True, tile_b=TILE_B,
                    mxu_dtype=jnp.float32)
    )
    ref_sm = mlp_reference(x, params, apply_softmax=True)
    assert jnp.allclose(out_sm, ref_sm, atol=1e-5, rtol=1e-5)

    # 3) bf16 MXU operands (recommended on v6e/v7x) with softmax: loose tolerance.
    out_bf16 = jax.block_until_ready(
        mlp_forward(x, params, apply_softmax=True, tile_b=TILE_B,
                    mxu_dtype=jnp.bfloat16)
    )
    assert jnp.allclose(out_bf16, ref_sm, atol=3e-2, rtol=3e-2)

    print("KERNEL_OK")
</pallas_src>

<mosaic_0001>
module attributes {stable_mosaic.version = 11 : i64} {
  func.func @_mlp_kernel(%arg0: i32, %arg1: memref<256x16xf32, #tpu.memory_space<vmem>>, %arg2: memref<16x32xf32, #tpu.memory_space<vmem>>, %arg3: memref<1x32xf32, #tpu.memory_space<vmem>>, %arg4: memref<32x32xf32, #tpu.memory_space<vmem>>, %arg5: memref<1x32xf32, #tpu.memory_space<vmem>>, %arg6: memref<32x128xf32, #tpu.memory_space<vmem>>, %arg7: memref<1x128xf32, #tpu.memory_space<vmem>>, %arg8: memref<256x128xf32, #tpu.memory_space<vmem>>) attributes {dimension_semantics = [#tpu.dimension_semantics<parallel>], iteration_bounds = array<i64: 2>, scalar_prefetch = 0 : i64, scratch_operands = 0 : i64, tpu.core_type = #tpu.core_type<tc>, window_params = [{transform_indices = @transform_0, window_bounds = array<i64: 256, 16>}, {pipeline_mode = #tpu.pipeline_mode<synchronous>, transform_indices = @transform_1, window_bounds = array<i64: 16, 32>}, {pipeline_mode = #tpu.pipeline_mode<synchronous>, transform_indices = @transform_2, window_bounds = array<i64: 1, 32>}, {pipeline_mode = #tpu.pipeline_mode<synchronous>, transform_indices = @transform_3, window_bounds = array<i64: 32, 32>}, {pipeline_mode = #tpu.pipeline_mode<synchronous>, transform_indices = @transform_4, window_bounds = array<i64: 1, 32>}, {pipeline_mode = #tpu.pipeline_mode<synchronous>, transform_indices = @transform_5, window_bounds = array<i64: 32, 128>}, {pipeline_mode = #tpu.pipeline_mode<synchronous>, transform_indices = @transform_6, window_bounds = array<i64: 1, 128>}, {transform_indices = @transform_7, window_bounds = array<i64: 256, 128>}]} {
    %c0 = arith.constant 0 : index
    %c0_0 = arith.constant 0 : index
    %0 = vector.load %arg1[%c0, %c0_0] : memref<256x16xf32, #tpu.memory_space<vmem>>, vector<256x16xf32>
    %c0_1 = arith.constant 0 : index
    %c0_2 = arith.constant 0 : index
    %1 = vector.load %arg2[%c0_1, %c0_2] : memref<16x32xf32, #tpu.memory_space<vmem>>, vector<16x32xf32>
    %c0_3 = arith.constant 0 : index
    %c0_4 = arith.constant 0 : index
    %2 = vector.load %arg3[%c0_3, %c0_4] : memref<1x32xf32, #tpu.memory_space<vmem>>, vector<1x32xf32>
    %cst = arith.constant dense<0.000000e+00> : vector<256x32xf32>
    %3 = tpu.matmul %0, %1, %cst {dimension_numbers = #tpu.dot_dimension_numbers<[1], [0], [0], [1], [0, 0, 1, 1], [], []>} : vector<256x16xf32>, vector<16x32xf32>, vector<256x32xf32> -> vector<256x32xf32>
    %4 = vector.broadcast %2 : vector<1x32xf32> to vector<256x32xf32>
    %5 = arith.addf %3, %4 : vector<256x32xf32>
    %cst_5 = arith.constant 0.000000e+00 : f32
    %6 = vector.broadcast %cst_5 : f32 to vector<256x32xf32>
    %7 = arith.maximumf %5, %6 : vector<256x32xf32>
    %c0_6 = arith.constant 0 : index
    %c0_7 = arith.constant 0 : index
    %8 = vector.load %arg4[%c0_6, %c0_7] : memref<32x32xf32, #tpu.memory_space<vmem>>, vector<32x32xf32>
    %c0_8 = arith.constant 0 : index
    %c0_9 = arith.constant 0 : index
    %9 = vector.load %arg5[%c0_8, %c0_9] : memref<1x32xf32, #tpu.memory_space<vmem>>, vector<1x32xf32>
    %cst_10 = arith.constant dense<0.000000e+00> : vector<256x32xf32>
    %10 = tpu.matmul %7, %8, %cst_10 {dimension_numbers = #tpu.dot_dimension_numbers<[1], [0], [0], [1], [0, 0, 1, 1], [], []>} : vector<256x32xf32>, vector<32x32xf32>, vector<256x32xf32> -> vector<256x32xf32>
    %11 = vector.broadcast %9 : vector<1x32xf32> to vector<256x32xf32>
    %12 = arith.addf %10, %11 : vector<256x32xf32>
    %cst_11 = arith.constant 0.000000e+00 : f32
    %13 = vector.broadcast %cst_11 : f32 to vector<256x32xf32>
    %14 = arith.maximumf %12, %13 : vector<256x32xf32>
    %c0_12 = arith.constant 0 : index
    %c0_13 = arith.constant 0 : index
    %15 = vector.load %arg6[%c0_12, %c0_13] : memref<32x128xf32, #tpu.memory_space<vmem>>, vector<32x128xf32>
    %c0_14 = arith.constant 0 : index
    %c0_15 = arith.constant 0 : index
    %16 = vector.load %arg7[%c0_14, %c0_15] : memref<1x128xf32, #tpu.memory_space<vmem>>, vector<1x128xf32>
    %cst_16 = arith.constant dense<0.000000e+00> : vector<256x128xf32>
    %17 = tpu.matmul %14, %15, %cst_16 {dimension_numbers = #tpu.dot_dimension_numbers<[1], [0], [0], [1], [0, 0, 1, 1], [], []>} : vector<256x32xf32>, vector<32x128xf32>, vector<256x128xf32> -> vector<256x128xf32>
    %18 = vector.broadcast %16 : vector<1x128xf32> to vector<256x128xf32>
    %19 = arith.addf %17, %18 : vector<256x128xf32>
    %c0_17 = arith.constant 0 : index
    %c0_18 = arith.constant 0 : index
    %20 = vector.load %arg8[%c0_17, %c0_18] : memref<256x128xf32, #tpu.memory_space<vmem>>, vector<256x128xf32>
    tpu.vector_store %arg8[%c0_17, %c0_18], %19 {strides = array<i32>} : memref<256x128xf32, #tpu.memory_space<vmem>>, vector<256x128xf32>,
    return
  }
  func.func @transform_0(%arg0: i32) -> (i32, i32) {
    %c0_i32 = arith.constant 0 : i32
    %c0_i32_0 = arith.constant 0 : i32
    return %arg0, %c0_i32 : i32, i32
  }
  func.func @transform_1(%arg0: i32) -> (i32, i32) {
    %c0_i32 = arith.constant 0 : i32
    %c0_i32_0 = arith.constant 0 : i32
    %c0_i32_1 = arith.constant 0 : i32
    return %c0_i32, %c0_i32_0 : i32, i32
  }
  func.func @transform_2(%arg0: i32) -> (i32, i32) {
    %c0_i32 = arith.constant 0 : i32
    %c0_i32_0 = arith.constant 0 : i32
    %c0_i32_1 = arith.constant 0 : i32
    return %c0_i32, %c0_i32_0 : i32, i32
  }
  func.func @transform_3(%arg0: i32) -> (i32, i32) {
    %c0_i32 = arith.constant 0 : i32
    %c0_i32_0 = arith.constant 0 : i32
    %c0_i32_1 = arith.constant 0 : i32
    return %c0_i32, %c0_i32_0 : i32, i32
  }
  func.func @transform_4(%arg0: i32) -> (i32, i32) {
    %c0_i32 = arith.constant 0 : i32
    %c0_i32_0 = arith.constant 0 : i32
    %c0_i32_1 = arith.constant 0 : i32
    return %c0_i32, %c0_i32_0 : i32, i32
  }
  func.func @transform_5(%arg0: i32) -> (i32, i32) {
    %c0_i32 = arith.constant 0 : i32
    %c0_i32_0 = arith.constant 0 : i32
    %c0_i32_1 = arith.constant 0 : i32
    return %c0_i32, %c0_i32_0 : i32, i32
  }
  func.func @transform_6(%arg0: i32) -> (i32, i32) {
    %c0_i32 = arith.constant 0 : i32
    %c0_i32_0 = arith.constant 0 : i32
    %c0_i32_1 = arith.constant 0 : i32
    return %c0_i32, %c0_i32_0 : i32, i32
  }
  func.func @transform_7(%arg0: i32) -> (i32, i32) {
    %c0_i32 = arith.constant 0 : i32
    %c0_i32_0 = arith.constant 0 : i32
    return %arg0, %c0_i32 : i32, i32
  }
}

</mosaic_0001>

<bundles_post_ra>
// kernel: tpu_custom_call.1
= control target key start
LH: loop header
LB: loop body
LE: loop exit
PB: predicated region body
PF: predicated region fallthrough
CT: control target
= control target key end

     0   :  { %12 = vsyncpa [#allocation3], 0  ;;  %s2432_s0 = inlined_call_operand.vmem [shape: f32[512,16], index: 0, kind: input, shape index: {}]   ;;  %s2433_s1 = inlined_call_operand.vmem [shape: f32[16,32], index: 1, kind: input, shape index: {}]   ;;  %s2434_s2 = inlined_call_operand.vmem [shape: f32[1,32], index: 2, kind: input, shape index: {}]   ;;  %s2435_s3 = inlined_call_operand.vmem [shape: f32[32,32], index: 3, kind: input, shape index: {}]   ;;  %s2436_s4 = inlined_call_operand.vmem [shape: f32[1,32], index: 4, kind: input, shape index: {}]   ;;  %s2437_s5 = inlined_call_operand.vmem [shape: f32[32,128], index: 5, kind: input, shape index: {}]   ;;  %s2438_s6 = inlined_call_operand.vmem [shape: f32[1,128], index: 6, kind: input, shape index: {}]   ;;  %s2439_s7 = inlined_call_operand.hbm [shape: f32[512,128], index: 7, kind: output, shape index: {}]  }
   0x1   :  { %14 = vsyncpa [#allocation3 + $0x1], 0  ;;  %s2012_s24 = smov 0   ;;  %s2014_s25 = smov 0  }
   0x2   :  { %s2016_s26 = smov 0   ;;  %s2018_s27 = smov 0  }
   0x3 LB: > { %s2033_s28 = sadd.s32 4294967295, %s1967_s27   ;;  %s1480_s29 = sadd.s32 4294967294, %s1967_s27   ;;  %s1967_s27 = sphi %s2018_s27, %s2445_s27   ;;  %s1963_s26 = sphi %s2016_s26, %s2444_s26   ;;  %s1959_s25 = sphi %s2014_s25, %s2443_s25   ;;  %s1955_s24 = sphi %s2012_s24, %s2442_s24  }
   0x4   : > { %s2037_s30 = sadd.s32 1, %s1967_s27   ;;  %s179_s8 = sadd.s32 1, %s1963_s26 }
   0x5   : > { %s176_s9 = ssub.s32 %s1967_s27, %s2037_s30  ;;  %p189_p0 = scmp.ne.s32.totalorder %s1963_s26, %s1959_s25 }
   0x6   : > { %p177_p1 = scmp.eq.s32.totalorder %s176_s9, 0  ;;  %p190_p2 = scmp.eq.s32.totalorder %s2033_s28, 1 }
   0x7   : > { %p195_p3 = scmp.ne.s32.totalorder %s1959_s25, %s1955_s24  ;;  %p196_p4 = scmp.eq.s32.totalorder %s1480_s29, 1 }
   0x8   : > { %s2048_s10 = scalar_select %p177_p1, %s1963_s26, %s179_s8  }
   0x9   : > { %p2050_p5 = por %p190_p2, %p189_p0  ;;  %p2054_p6 = por %p196_p4, %p195_p3 }
   0xa   : > { %p1483_p7 = scmp.ge.s32.totalorder %s1967_s27, 1  ;;  %p241_p8 = scmp.lt.s32.totalorder %s1967_s27, 3 }
   0xc   : > { %p242_p9 = pnand %p1483_p7, %p241_p8 }
   0xd   : > { %s1485_s17 = sshll.u32 (!%p242_p9), %s2033_s28, 5  ;;  %s270_s14 = sand.u32 (!%p242_p9), 1, %s1959_s25  }
   0xe   : > { %245 = sbr.rel (%p242_p9) target bundleno = 696 (0x2b8), region = 48  ;;  %p274_p10 = scmp.lt.s32.totalorder (!%p242_p9), %s1485_s17, 63 }
   0xf   : > { %s1484_s15 = sshll.u32 (!%p242_p9), %s270_s14, 8  ;;  %s1591_s19 = sshll.u32 (!%p242_p9), %s2033_s28, 12 }
  0x10   : > { %s2316_s18 = scalar_lea.vmem (!%p242_p9), [#allocation2], %s1484_s15  ;;  %s2392_s28 = scalar_lea.sflag (!%p242_p9), [#allocation3], %s270_s14 }
  0x11   : > { %s1969_s8 = smov (!%p242_p9), [#allocation2]  }
  0x12   : > { %s1911_s9 = sshll.u32 (!%p242_p9), %s1969_s8, 4  ;;  %s1912_s9 = int_to_ptr.vmem [resolvable:$false] %s1911_s9 }
  0x13   : > { %v313_v0 = vld [vmem:[%s2433_s1 + $0x8] sm:$0xff]  ;;  %v312_v1 = vld [vmem:[%s2433_s1] sm:$0xff]  ;;  %v678_v2 = vld [vmem:[%s2435_s3 + $0x18] sm:$0xff]  ;;  %s2447_s17 = smov (!%p274_p10, %s1485_s17), 63  ;;  %vm321_vm0 = vcmask 130048   ;;  %vm686_vm1 = vcmask 261120  }
  0x14   : > { %1698 = vmatprep.subr.mxu0 %v313_v0  ;;  %1862 = vmatprep.subr.mxu1 %v313_v0  ;;  %s1486_s20 = sshll.u32 %s2447_s17, 3  ;;  %v677_v11 = vld [vmem:[%s2435_s3 + $0x10] sm:$0xff]  ;;  %v676_v16 = vld [vmem:[%s2435_s3 + $0x8] sm:$0xff]  ;;  %v675_v18 = vld [vmem:[%s2435_s3] sm:$0xff]  ;;  %s1913_s13 = scalar_lea.vmem %s1912_s9, 8192 }
  0x15   : > { %1699 = vmatpush3.msra.mxu0 %v313_v0  ;;  %1864 = vmatpush3.msra.mxu1 %v313_v0  ;;  %s2073_s23 = scalar_lea.vmem %s2432_s0, %s1486_s20  ;;  %v1043_v38 = vld [vmem:[%s2437_s5 + $0x18] sm:$0xff]  ;;  %v1042_v39 = vld [vmem:[%s2437_s5 + $0x10] sm:$0xff]  ;;  %v1041_v40 = vld [vmem:[%s2437_s5 + $0x8] sm:$0xff]  ;;  %s1418_s20 = sshll.u32 %s2316_s18, 4  ;;  %s2385_s20 = int_to_ptr.vmem [resolvable:$true] %s1418_s20 }
  0x16   : > { %1700 = vmatprep.subr.mxu0 %v312_v1  ;;  %1863 = vmatprep.subr.mxu1 %v312_v1  ;;  %v280_v3 = vld [vmem:[%s2073_s23] sm:$0xff]  ;;  %v281_v4 = vld [vmem:[%s2073_s23 + $0x8] sm:$0xff]  ;;  %v282_v5 = vld [vmem:[%s2073_s23 + $0x10] sm:$0xff]  ;;  %s1907_s29 = scalar_lea.vmem %s2385_s20, 4096  ;;  %p1914_p0 = scmp.lt.s32.totalorder %s2385_s20, %s1912_s9 }
  0x17   : > { %1701 = vmatpush3.msra.mxu0 %v312_v1  ;;  %1865 = vmatpush3.msra.mxu1 %v312_v1  ;;  %v283_v6 = vld [vmem:[%s2073_s23 + $0x18] sm:$0xff]  ;;  %v284_v7 = vld [vmem:[%s2073_s23 + $0x20] sm:$0xff]  ;;  %v297_v9 = vld [vmem:[%s2073_s23 + $0x88] sm:$0xff]  ;;  %p1908_p11 = scmp.ne.s32.totalorder %s2385_s20, %s1907_s29  ;;  %p1915_p1 = scmp.lt.s32.totalorder %s1913_s13, %s1907_s29 }
  0x18   : > { %1750 = vmatprep.subr.mxu1 %v678_v2  ;;  %1702 = vmatprep.mubr.msk.f32.mxu0 %vm321_vm0, %v280_v3  ;;  %v296_v8 = vld [vmem:[%s2073_s23 + $0x80] sm:$0xff]  ;;  %v298_v10 = vld [vmem:[%s2073_s23 + $0x90] sm:$0xff]  ;;  %v285_v12 = vld [vmem:[%s2073_s23 + $0x28] sm:$0xff] }
  0x19   : > { %1703 = vmatmul.mubr.msk.f32.vlgmr.msra.gmra.mxu0 %vm321_vm0, %v281_v4  ;;  %1726 = vmatprep.mubr.msk.f32.mxu1 %vm321_vm0, %v296_v8  ;;  %v286_v13 = vld [vmem:[%s2073_s23 + $0x30] sm:$0xff]  ;;  %v299_v14 = vld [vmem:[%s2073_s23 + $0x98] sm:$0xff]  ;;  %v300_v15 = vld [vmem:[%s2073_s23 + $0xa0] sm:$0xff]  ;;  %p1909_p12 = pnand %p1908_p11, %p2050_p5  ;;  %p1916_p2 = por %p1915_p1, %p1914_p0 }
  0x1a   : > { %1705 = vmatprep.mubr.msk.f32.mxu0 %vm321_vm0, %v282_v5  ;;  %1727 = vmatmul.mubr.msk.f32.vlgmr.msra.gmra.mxu1 %vm321_vm0, %v297_v9  ;;  %v287_v17 = vld [vmem:[%s2073_s23 + $0x38] sm:$0xff]  ;;  %v288_v19 = vld [vmem:[%s2073_s23 + $0x40] sm:$0xff]  ;;  %v301_v20 = vld [vmem:[%s2073_s23 + $0xa8] sm:$0xff] }
  0x1b   : > { %1729 = vmatprep.mubr.msk.f32.mxu1 %vm321_vm0, %v298_v10  ;;  %1751 = vmatpush3.msra.mxu1 %v678_v2  ;;  %v302_v21 = vld [vmem:[%s2073_s23 + $0xb0] sm:$0xff]  ;;  %v289_v22 = vld [vmem:[%s2073_s23 + $0x48] sm:$0xff]  ;;  %v303_v24 = vld [vmem:[%s2073_s23 + $0xb8] sm:$0xff]  ;;  %p1910_p13 = pneg %p1909_p12 }
  0x1c   : > { %1752 = vmatprep.subr.mxu1 %v677_v11  ;;  %v290_v23 = vld [vmem:[%s2073_s23 + $0x50] sm:$0xff]  ;;  %v304_v25 = vld [vmem:[%s2073_s23 + $0xc0] sm:$0xff]  ;;  %v291_v26 = vld [vmem:[%s2073_s23 + $0x58] sm:$0xff]  ;;  %1806 = vmatprep.subr.mxu0 %v1043_v38 }
  0x1d   : > { %1706 = vmatmul.mubr.msk.f32.gmra.mxu0 %vm321_vm0, %v283_v6  ;;  %1753 = vmatpush3.msra.mxu1 %v677_v11  ;;  %v292_v27 = vld [vmem:[%s2073_s23 + $0x60] sm:$0xff]  ;;  %v305_v28 = vld [vmem:[%s2073_s23 + $0xc8] sm:$0xff]  ;;  %v306_v29 = vld [vmem:[%s2073_s23 + $0xd0] sm:$0xff]  ;;  %p1917_p3 = pnand %p1916_p2, %p1910_p13 }
  0x1e   : > { %1708 = vmatprep.mubr.msk.f32.mxu0 %vm321_vm0, %v284_v7  ;;  %1730 = vmatmul.mubr.msk.f32.gmra.mxu1 %vm321_vm0, %v299_v14  ;;  %v293_v30 = vld [vmem:[%s2073_s23 + $0x68] sm:$0xff]  ;;  %v294_v31 = vld [vmem:[%s2073_s23 + $0x70] sm:$0xff]  ;;  %v307_v32 = vld [vmem:[%s2073_s23 + $0xd8] sm:$0xff] }
  0x1f   : > { %1732 = vmatprep.mubr.msk.f32.mxu1 %vm321_vm0, %v300_v15  ;;  %1754 = vmatprep.subr.mxu1 %v676_v16  ;;  %v308_v33 = vld [vmem:[%s2073_s23 + $0xe0] sm:$0xff]  ;;  %v295_v34 = vld [vmem:[%s2073_s23 + $0x78] sm:$0xff]  ;;  %v309_v35 = vld [vmem:[%s2073_s23 + $0xe8] sm:$0xff] }
  0x20   : > { %1755 = vmatpush3.msra.mxu1 %v676_v16  ;;  %v310_v36 = vld [vmem:[%s2073_s23 + $0xf0] sm:$0xff]  ;;  %v311_v37 = vld [vmem:[%s2073_s23 + $0xf8] sm:$0xff]  ;;  %1807 = vmatpush3.msra.mxu0 %v1043_v38  ;;  %v1040_v41 = vld [vmem:[%s2437_s5] sm:$0xff]  ;;  %s2383_s23 = scalar_lea.hbm %s2439_s7, %s1591_s19 }
  0x21   : > { %1709 = vmatmul.mubr.msk.f32.gmra.mxu0 %vm321_vm0, %v285_v12  ;;  %1756 = vmatprep.subr.mxu1 %v675_v18  ;;  %v2163_v42 = vld [vmem:[%s2434_s2] ss:$0 sm:$0xff] }
  0x22   : > { %1711 = vmatprep.mubr.msk.f32.mxu0 %vm321_vm0, %v286_v13  ;;  %1733 = vmatmul.mubr.msk.f32.gmra.mxu1 %vm321_vm0, %v301_v20 }
  0x23   : > { %1735 = vmatprep.mubr.msk.f32.mxu1 %vm321_vm0, %v302_v21  ;;  %1757 = vmatpush3.msra.mxu1 %v675_v18 }
  0x24   : > { %1808 = vmatprep.subr.mxu0 %v1042_v39 }
  0x25   : > { %1712 = vmatmul.mubr.msk.f32.gmra.mxu0 %vm321_vm0, %v287_v17 }
  0x26   : > { %1714 = vmatprep.mubr.msk.f32.mxu0 %vm321_vm0, %v288_v19  ;;  %1736 = vmatmul.mubr.msk.f32.gmra.mxu1 %vm321_vm0, %v303_v24 }
  0x27   : > { %1738 = vmatprep.mubr.msk.f32.mxu1 %vm321_vm0, %v304_v25  ;;  %1809 = vmatpush3.msra.mxu0 %v1042_v39 }
  0x28   : > { %1810 = vmatprep.subr.mxu0 %v1041_v40 }
  0x29   : > { %1715 = vmatmul.mubr.msk.f32.gmra.mxu0 %vm321_vm0, %v289_v22 }
  0x2a   : > { %1717 = vmatprep.mubr.msk.f32.mxu0 %vm321_vm0, %v290_v23  ;;  %1739 = vmatmul.mubr.msk.f32.gmra.mxu1 %vm321_vm0, %v305_v28 }
  0x2b   : > { %1741 = vmatprep.mubr.msk.f32.mxu1 %vm321_vm0, %v306_v29  ;;  %1811 = vmatpush3.msra.mxu0 %v1041_v40 }
  0x2c   : > { %1812 = vmatprep.subr.mxu0 %v1040_v41 }
  0x2d   : > { %1718 = vmatmul.mubr.msk.f32.gmra.mxu0 %vm321_vm0, %v291_v26 }
  0x2e   : > { %1720 = vmatprep.mubr.msk.f32.mxu0 %vm321_vm0, %v292_v27  ;;  %1742 = vmatmul.mubr.msk.f32.gmra.mxu1 %vm321_vm0, %v307_v32 }
  0x2f   : > { %1744 = vmatprep.mubr.msk.f32.mxu1 %vm321_vm0, %v308_v33  ;;  %1813 = vmatpush3.msra.mxu0 %v1040_v41 }
  0x31   : > { %1721 = vmatmul.mubr.msk.f32.gmra.mxu0 %vm321_vm0, %v293_v30 }
  0x32   : > { %1723 = vmatprep.mubr.msk.f32.mxu0 %vm321_vm0, %v294_v31  ;;  %1745 = vmatmul.mubr.msk.f32.gmra.mxu1 %vm321_vm0, %v309_v35 }
  0x33   : > { %1747 = vmatprep.mubr.msk.f32.mxu1 %vm321_vm0, %v310_v36 }
  0x35   : > { %1724 = vmatmul.mubr.msk.f32.gmra.mxu0 %vm321_vm0, %v295_v34 }
  0x36   : > { %1748 = vmatmul.mubr.msk.f32.gmra.mxu1 %vm321_vm0, %v311_v37 }
  0xd9   : > { %v1704_v43 = vpop.f32.mrf.mxu0 }
  0xda   : > { %v490_v44 = vadd.f32 %v1704_v43, %v2163_v42  ;;  %v2167_v49 = vpop.f32.mrf.mxu1 }
  0xdb   : > { %v484_v45 = vpop.f32.mrf.mxu0  ;;  %v570_v40 = vadd.f32 %v2167_v49, %v2163_v42 }
  0xdc   : > { %v485_v46 = vadd.f32 %v2163_v42, %v484_v45  ;;  %v644_v50 = vmax.f32 %v490_v44, 0.0  ;;  %v564_v54 = vpop.f32.mrf.mxu1 }
  0xdd   : > { %v1707_v47 = vpop.f32.mrf.mxu0  ;;  %v565_v30 = vadd.f32 %v2163_v42, %v564_v54  ;;  %v660_v45 = vmax.f32 %v570_v40, 0.0 }
  0xde   : > { %v643_v48 = vmax.f32 %v485_v46, 0.0  ;;  %v500_v51 = vadd.f32 %v1707_v47, %v2163_v42  ;;  %v2173_v57 = vpop.f32.mrf.mxu1 }
  0xdf   : > { %v494_v52 = vpop.f32.mrf.mxu0  ;;  %v659_v37 = vmax.f32 %v565_v30, 0.0  ;;  %v580_v46 = vadd.f32 %v2173_v57, %v2163_v42 }
  0xe0   : > { %v495_v53 = vadd.f32 %v2163_v42, %v494_v52  ;;  %1758 = vmatprep.mubr.msk.f32.mxu1 %vm686_vm1, %v643_v48  ;;  %v646_v58 = vmax.f32 %v500_v51, 0.0  ;;  %v574_v62 = vpop.f32.mrf.mxu1 }
  0xe1   : > { %v1710_v55 = vpop.f32.mrf.mxu0  ;;  %1759 = vmatmul.mubr.msk.f32.vlgmr.msra.gmra.mxu1 %vm686_vm1, %v644_v50  ;;  %v575_v38 = vadd.f32 %v2163_v42, %v574_v62  ;;  %v662_v50 = vmax.f32 %v580_v46, 0.0 }
  0xe2   : > { %v645_v56 = vmax.f32 %v495_v53, 0.0  ;;  %v510_v59 = vadd.f32 %v1710_v55, %v2163_v42  ;;  %v2179_v1 = vpop.f32.mrf.mxu1 }
  0xe3   : > { %v504_v60 = vpop.f32.mrf.mxu0  ;;  %v661_v43 = vmax.f32 %v575_v38, 0.0  ;;  %v590_v51 = vadd.f32 %v2179_v1, %v2163_v42 }
  0xe4   : > { %v505_v61 = vadd.f32 %v2163_v42, %v504_v60  ;;  %1761 = vmatprep.mubr.msk.f32.mxu1 %vm686_vm1, %v645_v56  ;;  %v648_v2 = vmax.f32 %v510_v59, 0.0  ;;  %v584_v6 = vpop.f32.mrf.mxu1 }
  0xe5   : > { %v1713_v63 = vpop.f32.mrf.mxu0  ;;  %1762 = vmatmul.mubr.msk.f32.gmra.mxu1 %vm686_vm1, %v646_v58  ;;  %v585_v44 = vadd.f32 %v2163_v42, %v584_v6  ;;  %v664_v55 = vmax.f32 %v590_v51, 0.0 }
  0xe6   : > { %v647_v0 = vmax.f32 %v505_v61, 0.0  ;;  %v520_v3 = vadd.f32 %v1713_v63, %v2163_v42  ;;  %v1737_v12 = vpop.f32.mrf.mxu1 }
  0xe7   : > { %v514_v4 = vpop.f32.mrf.mxu0  ;;  %v663_v48 = vmax.f32 %v585_v44, 0.0  ;;  %v600_v56 = vadd.f32 %v1737_v12, %v2163_v42  ;;  %v2241_v12 = vld [vmem:[%s2436_s4] ss:$0 sm:$0xff] }
  0xe8   : > { %v515_v5 = vadd.f32 %v2163_v42, %v514_v4  ;;  %1764 = vmatprep.mubr.msk.f32.mxu1 %vm686_vm1, %v647_v0  ;;  %v650_v9 = vmax.f32 %v520_v3, 0.0  ;;  %v594_v19 = vpop.f32.mrf.mxu1 }
  0xe9   : > { %v1716_v7 = vpop.f32.mrf.mxu0  ;;  %1765 = vmatmul.mubr.msk.f32.gmra.mxu1 %vm686_vm1, %v648_v2  ;;  %v595_v49 = vadd.f32 %v2163_v42, %v594_v19  ;;  %v666_v60 = vmax.f32 %v600_v56, 0.0 }
  0xea   : > { %v649_v8 = vmax.f32 %v515_v5, 0.0  ;;  %v530_v10 = vadd.f32 %v1716_v7, %v2163_v42  ;;  %v1740_v26 = vpop.f32.mrf.mxu1 }
  0xeb   : > { %v524_v11 = vpop.f32.mrf.mxu0  ;;  %v665_v53 = vmax.f32 %v595_v49, 0.0  ;;  %v610_v61 = vadd.f32 %v1740_v26, %v2163_v42 }
  0xec   : > { %v525_v13 = vadd.f32 %v2163_v42, %v524_v11  ;;  %1767 = vmatprep.mubr.msk.f32.mxu1 %vm686_vm1, %v649_v8  ;;  %v652_v16 = vmax.f32 %v530_v10, 0.0  ;;  %v604_v34 = vpop.f32.mrf.mxu1 }
  0xed   : > { %v1719_v14 = vpop.f32.mrf.mxu0  ;;  %1768 = vmatmul.mubr.msk.f32.gmra.mxu1 %vm686_vm1, %v650_v9  ;;  %v605_v54 = vadd.f32 %v2163_v42, %v604_v34  ;;  %v668_v1 = vmax.f32 %v610_v61, 0.0 }
  0xee   : > { %v651_v15 = vmax.f32 %v525_v13, 0.0  ;;  %v540_v17 = vadd.f32 %v1719_v14, %v2163_v42  ;;  %v1743_v41 = vpop.f32.mrf.mxu1 }
  0xef   : > { %v534_v18 = vpop.f32.mrf.mxu0  ;;  %v667_v58 = vmax.f32 %v605_v54, 0.0  ;;  %v620_v2 = vadd.f32 %v1743_v41, %v2163_v42 }
  0xf0   : > { %v535_v20 = vadd.f32 %v2163_v42, %v534_v18  ;;  %1770 = vmatprep.mubr.msk.f32.mxu1 %vm686_vm1, %v651_v15  ;;  %v654_v23 = vmax.f32 %v540_v17, 0.0  ;;  %v614_v47 = vpop.f32.mrf.mxu1 }
  0xf1   : > { %v1722_v21 = vpop.f32.mrf.mxu0  ;;  %1771 = vmatmul.mubr.msk.f32.gmra.mxu1 %vm686_vm1, %v652_v16  ;;  %v615_v59 = vadd.f32 %v2163_v42, %v614_v47  ;;  %v670_v6 = vmax.f32 %v620_v2, 0.0 }
  0xf2   : > { %v653_v22 = vmax.f32 %v535_v20, 0.0  ;;  %v550_v24 = vadd.f32 %v1722_v21, %v2163_v42  ;;  %v1746_v52 = vpop.f32.mrf.mxu1 }
  0xf3   : > { %v544_v25 = vpop.f32.mrf.mxu0  ;;  %v669_v63 = vmax.f32 %v615_v59, 0.0  ;;  %v630_v7 = vadd.f32 %v1746_v52, %v2163_v42 }
  0xf4   : > { %v545_v27 = vadd.f32 %v2163_v42, %v544_v25  ;;  %1773 = vmatprep.mubr.msk.f32.mxu1 %vm686_vm1, %v653_v22  ;;  %v656_v31 = vmax.f32 %v550_v24, 0.0  ;;  %v624_v57 = vpop.f32.mrf.mxu1 }
  0xf5   : > { %v1725_v28 = vpop.f32.mrf.mxu0  ;;  %1774 = vmatmul.mubr.msk.f32.gmra.mxu1 %vm686_vm1, %v654_v23  ;;  %v625_v0 = vadd.f32 %v2163_v42, %v624_v57  ;;  %v672_v9 = vmax.f32 %v630_v7, 0.0 }
  0xf6   : > { %v655_v29 = vmax.f32 %v545_v27, 0.0  ;;  %v560_v32 = vadd.f32 %v1725_v28, %v2163_v42  ;;  %v1749_v62 = vpop.f32.mrf.mxu1 }
  0xf7   : > { %v554_v33 = vpop.f32.mrf.mxu0  ;;  %v671_v4 = vmax.f32 %v625_v0, 0.0  ;;  %v640_v10 = vadd.f32 %v1749_v62, %v2163_v42 }
  0xf8   : > { %v555_v35 = vadd.f32 %v2163_v42, %v554_v33  ;;  %1776 = vmatprep.mubr.msk.f32.mxu1 %vm686_vm1, %v655_v29  ;;  %v658_v39 = vmax.f32 %v560_v32, 0.0  ;;  %v634_v3 = vpop.f32.mrf.mxu1 }
  0xf9   : > { %1777 = vmatmul.mubr.msk.f32.gmra.mxu1 %vm686_vm1, %v656_v31  ;;  %v635_v5 = vadd.f32 %v2163_v42, %v634_v3  ;;  %v674_v11 = vmax.f32 %v640_v10, 0.0 }
  0xfa   : > { %v657_v36 = vmax.f32 %v555_v35, 0.0 }
  0xfb   : > { %v673_v8 = vmax.f32 %v635_v5, 0.0 }
  0xfc   : > { %1779 = vmatprep.mubr.msk.f32.mxu1 %vm686_vm1, %v657_v36 }
  0xfd   : > { %1780 = vmatmul.mubr.msk.f32.gmra.mxu1 %vm686_vm1, %v658_v39 }
  0xfe   : > { %1782 = vmatprep.mubr.msk.f32.mxu1 %vm686_vm1, %v659_v37 }
 0x101   : > { %1783 = vmatmul.mubr.msk.f32.gmra.mxu1 %vm686_vm1, %v660_v45 }
 0x102   : > { %1785 = vmatprep.mubr.msk.f32.mxu1 %vm686_vm1, %v661_v43 }
 0x105   : > { %1786 = vmatmul.mubr.msk.f32.gmra.mxu1 %vm686_vm1, %v662_v50 }
 0x106   : > { %1788 = vmatprep.mubr.msk.f32.mxu1 %vm686_vm1, %v663_v48 }
 0x109   : > { %1789 = vmatmul.mubr.msk.f32.gmra.mxu1 %vm686_vm1, %v664_v55 }
 0x10a   : > { %1791 = vmatprep.mubr.msk.f32.mxu1 %vm686_vm1, %v665_v53 }
 0x10d   : > { %1792 = vmatmul.mubr.msk.f32.gmra.mxu1 %vm686_vm1, %v666_v60 }
 0x10e   : > { %1794 = vmatprep.mubr.msk.f32.mxu1 %vm686_vm1, %v667_v58 }
 0x111   : > { %1795 = vmatmul.mubr.msk.f32.gmra.mxu1 %vm686_vm1, %v668_v1 }
 0x112   : > { %1797 = vmatprep.mubr.msk.f32.mxu1 %vm686_vm1, %v669_v63 }
 0x115   : > { %1798 = vmatmul.mubr.msk.f32.gmra.mxu1 %vm686_vm1, %v670_v6 }
 0x116   : > { %1800 = vmatprep.mubr.msk.f32.mxu1 %vm686_vm1, %v671_v4 }
 0x119   : > { %1801 = vmatmul.mubr.msk.f32.gmra.mxu1 %vm686_vm1, %v672_v9 }
 0x11a   : > { %1803 = vmatprep.mubr.msk.f32.mxu1 %vm686_vm1, %v673_v8 }
 0x11d   : > { %1804 = vmatmul.mubr.msk.f32.gmra.mxu1 %vm686_vm1, %v674_v11 }
 0x1a1   : > { %v1760_v13 = vpop.f32.mrf.mxu1 }
 0x1a2   : > { %v855_v14 = vadd.f32 %v1760_v13, %v2241_v12 }
 0x1a3   : > { %v849_v15 = vpop.f32.mrf.mxu1 }
 0x1a4   : > { %v850_v16 = vadd.f32 %v2241_v12, %v849_v15  ;;  %v1009_v18 = vmax.f32 %v855_v14, 0.0 }
 0x1a5   : > { %v1763_v17 = vpop.f32.mrf.mxu1 }
 0x1a6   : > { %v1008_v42 = vmax.f32 %v850_v16, 0.0  ;;  %v865_v19 = vadd.f32 %v1763_v17, %v2241_v12 }
 0x1a7   : > { %v859_v20 = vpop.f32.mrf.mxu1 }
 0x1a8   : > { %v860_v21 = vadd.f32 %v2241_v12, %v859_v20  ;;  %1814 = vmatprep.mubr.msk.f32.mxu0 %vm686_vm1, %v1008_v42  ;;  %v1011_v24 = vmax.f32 %v865_v19, 0.0 }
 0x1a9   : > { %v1766_v22 = vpop.f32.mrf.mxu1  ;;  %1815 = vmatmul.mubr.msk.f32.vlgmr.msra.gmra.mxu0 %vm686_vm1, %v1009_v18 }
 0x1aa   : > { %v1010_v23 = vmax.f32 %v860_v21, 0.0  ;;  %v875_v25 = vadd.f32 %v1766_v22, %v2241_v12 }
 0x1ab   : > { %v869_v26 = vpop.f32.mrf.mxu1 }
 0x1ac   : > { %v870_v27 = vadd.f32 %v2241_v12, %v869_v26  ;;  %1817 = vmatprep.mubr.msk.f32.mxu0 %vm686_vm1, %v1010_v23  ;;  %v1013_v30 = vmax.f32 %v875_v25, 0.0 }
 0x1ad   : > { %v1769_v28 = vpop.f32.mrf.mxu1  ;;  %1818 = vmatmul.mubr.msk.f32.gmra.mxu0 %vm686_vm1, %v1011_v24 }
 0x1ae   : > { %v1012_v29 = vmax.f32 %v870_v27, 0.0  ;;  %v885_v31 = vadd.f32 %v1769_v28, %v2241_v12 }
 0x1af   : > { %v879_v32 = vpop.f32.mrf.mxu1 }
 0x1b0   : > { %v880_v33 = vadd.f32 %v2241_v12, %v879_v32  ;;  %1820 = vmatprep.mubr.msk.f32.mxu0 %vm686_vm1, %v1012_v29  ;;  %v1015_v36 = vmax.f32 %v885_v31, 0.0 }
 0x1b1   : > { %v1772_v34 = vpop.f32.mrf.mxu1  ;;  %1821 = vmatmul.mubr.msk.f32.gmra.mxu0 %vm686_vm1, %v1013_v30 }
 0x1b2   : > { %v1014_v35 = vmax.f32 %v880_v33, 0.0  ;;  %v895_v37 = vadd.f32 %v1772_v34, %v2241_v12 }
 0x1b3   : > { %v889_v38 = vpop.f32.mrf.mxu1 }
 0x1b4   : > { %v890_v39 = vadd.f32 %v2241_v12, %v889_v38  ;;  %1823 = vmatprep.mubr.msk.f32.mxu0 %vm686_vm1, %v1014_v35  ;;  %v1017_v43 = vmax.f32 %v895_v37, 0.0 }
 0x1b5   : > { %v1775_v40 = vpop.f32.mrf.mxu1  ;;  %1824 = vmatmul.mubr.msk.f32.gmra.mxu0 %vm686_vm1, %v1015_v36 }
 0x1b6   : > { %v1016_v41 = vmax.f32 %v890_v39, 0.0  ;;  %v905_v44 = vadd.f32 %v1775_v40, %v2241_v12 }
 0x1b7   : > { %v899_v45 = vpop.f32.mrf.mxu1 }
 0x1b8   : > { %v900_v46 = vadd.f32 %v2241_v12, %v899_v45  ;;  %1826 = vmatprep.mubr.msk.f32.mxu0 %vm686_vm1, %v1016_v41  ;;  %v1019_v49 = vmax.f32 %v905_v44, 0.0 }
 0x1b9   : > { %v1778_v47 = vpop.f32.mrf.mxu1  ;;  %1827 = vmatmul.mubr.msk.f32.gmra.mxu0 %vm686_vm1, %v1017_v43 }
 0x1ba   : > { %v1018_v48 = vmax.f32 %v900_v46, 0.0  ;;  %v915_v50 = vadd.f32 %v1778_v47, %v2241_v12  ;;  %v2313_v46 = vld [vmem:[%s2438_s6] ss:$0 sm:$0xff] }
 0x1bb   : > { %v909_v51 = vpop.f32.mrf.mxu1 }
 0x1bc   : > { %v910_v52 = vadd.f32 %v2241_v12, %v909_v51  ;;  %1829 = vmatprep.mubr.msk.f32.mxu0 %vm686_vm1, %v1018_v48  ;;  %v1021_v55 = vmax.f32 %v915_v50, 0.0 }
 0x1bd   : > { %v1781_v53 = vpop.f32.mrf.mxu1  ;;  %1830 = vmatmul.mubr.msk.f32.gmra.mxu0 %vm686_vm1, %v1019_v49 }
 0x1be   : > { %v1020_v54 = vmax.f32 %v910_v52, 0.0  ;;  %v925_v56 = vadd.f32 %v1781_v53, %v2241_v12 }
 0x1bf   : > { %v919_v57 = vpop.f32.mrf.mxu1 }
 0x1c0   : > { %v920_v58 = vadd.f32 %v2241_v12, %v919_v57  ;;  %1832 = vmatprep.mubr.msk.f32.mxu0 %vm686_vm1, %v1020_v54  ;;  %v1023_v61 = vmax.f32 %v925_v56, 0.0 }
 0x1c1   : > { %v1784_v59 = vpop.f32.mrf.mxu1  ;;  %1833 = vmatmul.mubr.msk.f32.gmra.mxu0 %vm686_vm1, %v1021_v55 }
 0x1c2   : > { %v1022_v60 = vmax.f32 %v920_v58, 0.0  ;;  %v935_v62 = vadd.f32 %v1784_v59, %v2241_v12 }
 0x1c3   : > { %v929_v63 = vpop.f32.mrf.mxu1 }
 0x1c4   : > { %v930_v0 = vadd.f32 %v2241_v12, %v929_v63  ;;  %1835 = vmatprep.mubr.msk.f32.mxu0 %vm686_vm1, %v1022_v60  ;;  %v1025_v3 = vmax.f32 %v935_v62, 0.0 }
 0x1c5   : > { %v1787_v1 = vpop.f32.mrf.mxu1  ;;  %1836 = vmatmul.mubr.msk.f32.gmra.mxu0 %vm686_vm1, %v1023_v61 }
 0x1c6   : > { %v1024_v2 = vmax.f32 %v930_v0, 0.0  ;;  %v945_v4 = vadd.f32 %v1787_v1, %v2241_v12 }
 0x1c7   : > { %v939_v5 = vpop.f32.mrf.mxu1 }
 0x1c8   : > { %v940_v6 = vadd.f32 %v2241_v12, %v939_v5  ;;  %1838 = vmatprep.mubr.msk.f32.mxu0 %vm686_vm1, %v1024_v2  ;;  %v1027_v9 = vmax.f32 %v945_v4, 0.0 }
 0x1c9   : > { %v1790_v7 = vpop.f32.mrf.mxu1  ;;  %1839 = vmatmul.mubr.msk.f32.gmra.mxu0 %vm686_vm1, %v1025_v3 }
 0x1ca   : > { %v1026_v8 = vmax.f32 %v940_v6, 0.0  ;;  %v955_v10 = vadd.f32 %v1790_v7, %v2241_v12 }
 0x1cb   : > { %v949_v11 = vpop.f32.mrf.mxu1 }
 0x1cc   : > { %v950_v13 = vadd.f32 %v2241_v12, %v949_v11  ;;  %1841 = vmatprep.mubr.msk.f32.mxu0 %vm686_vm1, %v1026_v8  ;;  %v1029_v16 = vmax.f32 %v955_v10, 0.0 }
 0x1cd   : > { %v1793_v14 = vpop.f32.mrf.mxu1  ;;  %1842 = vmatmul.mubr.msk.f32.gmra.mxu0 %vm686_vm1, %v1027_v9 }
 0x1ce   : > { %v1028_v15 = vmax.f32 %v950_v13, 0.0  ;;  %v965_v17 = vadd.f32 %v1793_v14, %v2241_v12 }
 0x1cf   : > { %v959_v42 = vpop.f32.mrf.mxu1 }
 0x1d0   : > { %v960_v18 = vadd.f32 %v2241_v12, %v959_v42  ;;  %1844 = vmatprep.mubr.msk.f32.mxu0 %vm686_vm1, %v1028_v15  ;;  %v1031_v21 = vmax.f32 %v965_v17, 0.0 }
 0x1d1   : > { %v1796_v19 = vpop.f32.mrf.mxu1  ;;  %1845 = vmatmul.mubr.msk.f32.gmra.mxu0 %vm686_vm1, %v1029_v16 }
 0x1d2   : > { %v1030_v20 = vmax.f32 %v960_v18, 0.0  ;;  %v975_v22 = vadd.f32 %v1796_v19, %v2241_v12 }
 0x1d3   : > { %v969_v23 = vpop.f32.mrf.mxu1 }
 0x1d4   : > { %v970_v24 = vadd.f32 %v2241_v12, %v969_v23  ;;  %1847 = vmatprep.mubr.msk.f32.mxu0 %vm686_vm1, %v1030_v20  ;;  %v1033_v27 = vmax.f32 %v975_v22, 0.0 }
 0x1d5   : > { %v1799_v25 = vpop.f32.mrf.mxu1  ;;  %1848 = vmatmul.mubr.msk.f32.gmra.mxu0 %vm686_vm1, %v1031_v21 }
 0x1d6   : > { %v1032_v26 = vmax.f32 %v970_v24, 0.0  ;;  %v985_v28 = vadd.f32 %v1799_v25, %v2241_v12 }
 0x1d7   : > { %v979_v29 = vpop.f32.mrf.mxu1 }
 0x1d8   : > { %v980_v30 = vadd.f32 %v2241_v12, %v979_v29  ;;  %1850 = vmatprep.mubr.msk.f32.mxu0 %vm686_vm1, %v1032_v26  ;;  %v1035_v33 = vmax.f32 %v985_v28, 0.0 }
 0x1d9   : > { %v1802_v31 = vpop.f32.mrf.mxu1  ;;  %1851 = vmatmul.mubr.msk.f32.gmra.mxu0 %vm686_vm1, %v1033_v27 }
 0x1da   : > { %v1034_v32 = vmax.f32 %v980_v30, 0.0  ;;  %v995_v34 = vadd.f32 %v1802_v31, %v2241_v12 }
 0x1db   : > { %v989_v35 = vpop.f32.mrf.mxu1 }
 0x1dc   : > { %v990_v36 = vadd.f32 %v2241_v12, %v989_v35  ;;  %1853 = vmatprep.mubr.msk.f32.mxu0 %vm686_vm1, %v1034_v32  ;;  %v1037_v39 = vmax.f32 %v995_v34, 0.0 }
 0x1dd   : > { %v1805_v37 = vpop.f32.mrf.mxu1  ;;  %1854 = vmatmul.mubr.msk.f32.gmra.mxu0 %vm686_vm1, %v1035_v33 }
 0x1de   : > { %v1036_v38 = vmax.f32 %v990_v36, 0.0  ;;  %v1005_v40 = vadd.f32 %v1805_v37, %v2241_v12 }
 0x1df   : > { %v999_v41 = vpop.f32.mrf.mxu1 }
 0x1e0   : > { %v1000_v43 = vadd.f32 %v2241_v12, %v999_v41  ;;  %1856 = vmatprep.mubr.msk.f32.mxu0 %vm686_vm1, %v1036_v38  ;;  %v1039_v45 = vmax.f32 %v1005_v40, 0.0 }
 0x1e1   : > { %1857 = vmatmul.mubr.msk.f32.gmra.mxu0 %vm686_vm1, %v1037_v39 }
 0x1e2   : > { %v1038_v44 = vmax.f32 %v1000_v43, 0.0 }
 0x1e4   : > { %1859 = vmatprep.mubr.msk.f32.mxu0 %vm686_vm1, %v1038_v44 }
 0x1e5   : > { %1860 = vmatmul.mubr.msk.f32.gmra.mxu0 %vm686_vm1, %v1039_v45 }
 0x269   : > { %v1816_v47 = vpop.f32.mrf.mxu0 }
 0x26a   : > { %v1219_v12 = vadd.f32 %v1816_v47, %v2313_v46 }
 0x26b   : > { %v1213_v48 = vpop.f32.mrf.mxu0 }
 0x26c   : > { %1373 = vst [vmem:[%s2316_s18 + $0x8] sm:$0xff] %v1219_v12  ;;  %v1214_v49 = vadd.f32 %v2313_v46, %v1213_v48 }
 0x26d   : > { %v1819_v50 = vpop.f32.mrf.mxu0 }
 0x26e   : > { %1372 = vst [vmem:[%s2316_s18] sm:$0xff] %v1214_v49  ;;  %v1229_v51 = vadd.f32 %v1819_v50, %v2313_v46 }
 0x26f   : > { %v1223_v52 = vpop.f32.mrf.mxu0 }
 0x270   : > { %1375 = vst [vmem:[%s2316_s18 + $0x18] sm:$0xff] %v1229_v51  ;;  %v1224_v53 = vadd.f32 %v2313_v46, %v1223_v52 }
 0x271   : > { %v1822_v54 = vpop.f32.mrf.mxu0 }
 0x272   : > { %1374 = vst [vmem:[%s2316_s18 + $0x10] sm:$0xff] %v1224_v53  ;;  %v1239_v55 = vadd.f32 %v1822_v54, %v2313_v46 }
 0x273   : > { %v1233_v56 = vpop.f32.mrf.mxu0 }
 0x274   : > { %1377 = vst [vmem:[%s2316_s18 + $0x28] sm:$0xff] %v1239_v55  ;;  %v1234_v57 = vadd.f32 %v2313_v46, %v1233_v56 }
 0x275   : > { %v1825_v58 = vpop.f32.mrf.mxu0 }
 0x276   : > { %1376 = vst [vmem:[%s2316_s18 + $0x20] sm:$0xff] %v1234_v57  ;;  %v1249_v59 = vadd.f32 %v1825_v58, %v2313_v46 }
 0x277   : > { %v1243_v60 = vpop.f32.mrf.mxu0 }
 0x278   : > { %1379 = vst [vmem:[%s2316_s18 + $0x38] sm:$0xff] %v1249_v59  ;;  %v1244_v61 = vadd.f32 %v2313_v46, %v1243_v60 }
 0x279   : > { %v1828_v62 = vpop.f32.mrf.mxu0 }
 0x27a   : > { %1378 = vst [vmem:[%s2316_s18 + $0x30] sm:$0xff] %v1244_v61  ;;  %v1259_v63 = vadd.f32 %v1828_v62, %v2313_v46 }
 0x27b   : > { %v1253_v0 = vpop.f32.mrf.mxu0 }
 0x27c   : > { %1381 = vst [vmem:[%s2316_s18 + $0x48] sm:$0xff] %v1259_v63  ;;  %v1254_v1 = vadd.f32 %v2313_v46, %v1253_v0 }
 0x27d   : > { %v1831_v2 = vpop.f32.mrf.mxu0 }
 0x27e   : > { %1380 = vst [vmem:[%s2316_s18 + $0x40] sm:$0xff] %v1254_v1  ;;  %v1269_v3 = vadd.f32 %v1831_v2, %v2313_v46 }
 0x27f   : > { %v1263_v4 = vpop.f32.mrf.mxu0 }
 0x280   : > { %1383 = vst [vmem:[%s2316_s18 + $0x58] sm:$0xff] %v1269_v3  ;;  %v1264_v5 = vadd.f32 %v2313_v46, %v1263_v4 }
 0x281   : > { %v1834_v6 = vpop.f32.mrf.mxu0 }
 0x282   : > { %1382 = vst [vmem:[%s2316_s18 + $0x50] sm:$0xff] %v1264_v5  ;;  %v1279_v7 = vadd.f32 %v1834_v6, %v2313_v46 }
 0x283   : > { %v1273_v8 = vpop.f32.mrf.mxu0 }
 0x284   : > { %1385 = vst [vmem:[%s2316_s18 + $0x68] sm:$0xff] %v1279_v7  ;;  %v1274_v9 = vadd.f32 %v2313_v46, %v1273_v8 }
 0x285   : > { %v1837_v10 = vpop.f32.mrf.mxu0 }
 0x286   : > { %1384 = vst [vmem:[%s2316_s18 + $0x60] sm:$0xff] %v1274_v9  ;;  %v1289_v11 = vadd.f32 %v1837_v10, %v2313_v46 }
 0x287   : > { %v1283_v13 = vpop.f32.mrf.mxu0 }
 0x288   : > { %1387 = vst [vmem:[%s2316_s18 + $0x78] sm:$0xff] %v1289_v11  ;;  %v1284_v14 = vadd.f32 %v2313_v46, %v1283_v13 }
 0x289   : > { %v1840_v15 = vpop.f32.mrf.mxu0 }
 0x28a   : > { %1386 = vst [vmem:[%s2316_s18 + $0x70] sm:$0xff] %v1284_v14  ;;  %v1299_v16 = vadd.f32 %v1840_v15, %v2313_v46 }
 0x28b   : > { %v1293_v17 = vpop.f32.mrf.mxu0 }
 0x28c   : > { %1389 = vst [vmem:[%s2316_s18 + $0x88] sm:$0xff] %v1299_v16  ;;  %v1294_v42 = vadd.f32 %v2313_v46, %v1293_v17 }
 0x28d   : > { %v1843_v18 = vpop.f32.mrf.mxu0 }
 0x28e   : > { %1388 = vst [vmem:[%s2316_s18 + $0x80] sm:$0xff] %v1294_v42  ;;  %v1309_v19 = vadd.f32 %v1843_v18, %v2313_v46 }
 0x28f   : > { %v1303_v20 = vpop.f32.mrf.mxu0 }
 0x290   : > { %1391 = vst [vmem:[%s2316_s18 + $0x98] sm:$0xff] %v1309_v19  ;;  %v1304_v21 = vadd.f32 %v2313_v46, %v1303_v20 }
 0x291   : > { %v1846_v22 = vpop.f32.mrf.mxu0 }
 0x292   : > { %1390 = vst [vmem:[%s2316_s18 + $0x90] sm:$0xff] %v1304_v21  ;;  %v1319_v23 = vadd.f32 %v1846_v22, %v2313_v46 }
 0x293   : > { %v1313_v24 = vpop.f32.mrf.mxu0 }
 0x294   : > { %1393 = vst [vmem:[%s2316_s18 + $0xa8] sm:$0xff] %v1319_v23  ;;  %v1314_v25 = vadd.f32 %v2313_v46, %v1313_v24 }
 0x295   : > { %v1849_v26 = vpop.f32.mrf.mxu0 }
 0x296   : > { %1392 = vst [vmem:[%s2316_s18 + $0xa0] sm:$0xff] %v1314_v25  ;;  %v1329_v27 = vadd.f32 %v1849_v26, %v2313_v46 }
 0x297   : > { %v1323_v28 = vpop.f32.mrf.mxu0 }
 0x298   : > { %1395 = vst [vmem:[%s2316_s18 + $0xb8] sm:$0xff] %v1329_v27  ;;  %v1324_v29 = vadd.f32 %v2313_v46, %v1323_v28 }
 0x299   : > { %v1852_v30 = vpop.f32.mrf.mxu0 }
 0x29a   : > { %1394 = vst [vmem:[%s2316_s18 + $0xb0] sm:$0xff] %v1324_v29  ;;  %v1339_v31 = vadd.f32 %v1852_v30, %v2313_v46 }
 0x29b   : > { %v1333_v32 = vpop.f32.mrf.mxu0 }
 0x29c   : > { %1397 = vst [vmem:[%s2316_s18 + $0xc8] sm:$0xff] %v1339_v31  ;;  %v1334_v33 = vadd.f32 %v2313_v46, %v1333_v32 }
 0x29d   : > { %v1855_v34 = vpop.f32.mrf.mxu0 }
 0x29e   : > { %1396 = vst [vmem:[%s2316_s18 + $0xc0] sm:$0xff] %v1334_v33  ;;  %v1349_v35 = vadd.f32 %v1855_v34, %v2313_v46 }
 0x29f   : > { %v1343_v36 = vpop.f32.mrf.mxu0 }
 0x2a0   : > { %1399 = vst [vmem:[%s2316_s18 + $0xd8] sm:$0xff] %v1349_v35  ;;  %v1344_v37 = vadd.f32 %v2313_v46, %v1343_v36 }
 0x2a1   : > { %v1858_v38 = vpop.f32.mrf.mxu0 }
 0x2a2   : > { %1398 = vst [vmem:[%s2316_s18 + $0xd0] sm:$0xff] %v1344_v37  ;;  %v1359_v39 = vadd.f32 %v1858_v38, %v2313_v46 }
 0x2a3   : > { %v1353_v40 = vpop.f32.mrf.mxu0 }
 0x2a4   : > { %1401 = vst [vmem:[%s2316_s18 + $0xe8] sm:$0xff] %v1359_v39  ;;  %v1354_v41 = vadd.f32 %v2313_v46, %v1353_v40 }
 0x2a5   : > { %v1861_v43 = vpop.f32.mrf.mxu0 }
 0x2a6   : > { %1400 = vst [vmem:[%s2316_s18 + $0xe0] sm:$0xff] %v1354_v41  ;;  %v1369_v44 = vadd.f32 %v1861_v43, %v2313_v46 }
 0x2a7   : > { %v1363_v45 = vpop.f32.mrf.mxu0 }
 0x2a8   : > { %1403 = vst [vmem:[%s2316_s18 + $0xf8] sm:$0xff] %v1369_v44  ;;  %v1364_v47 = vadd.f32 %v2313_v46, %v1363_v45 }
 0x2aa   : > { %1402 = vst [vmem:[%s2316_s18 + $0xf0] sm:$0xff] %v1364_v47 }
 0x2ab   : > { %1920 = shalt.err (!%p1917_p3)
}
 0x2ac   : > { %s1921_s14 = scalar_lea.hbm %s2383_s23, 4096  ;;  %s1925_s17 = scalar_lea.hbm %s2439_s7, 8192 }
 0x2ad   : > { %p1922_p4 = scmp.ne.s32.totalorder %s2383_s23, %s1921_s14  ;;  %p1926_p9 = scmp.lt.s32.totalorder %s2383_s23, %s2439_s7 }
 0x2ae   : > { %p1927_p10 = scmp.lt.s32.totalorder %s1925_s17, %s1921_s14 }
 0x2af   : > { %p1923_p7 = pnand %p1922_p4, %p2050_p5 }
 0x2b0   : > { %p1928_p11 = por %p1927_p10, %p1926_p9 }
 0x2b1   : > { %p1924_p8 = pneg %p1923_p7 }
 0x2b3   : > { %p1929_p12 = pnand %p1928_p11, %p1924_p8 }
 0x2b5   : > { %1932 = shalt.err (!%p1929_p12)
}
 0x2b6   : > { %s1970_s21 = smov 128   ;;  %s1971_s22 = smov 8  }
 0x2b7   : > { %1866 = dma.vmem_to_hbm [thread:$0]  (%p2050_p5), %s2385_s20, 4096, %s2383_s23, %s2392_s28, %s1970_s21, %s1970_s21, %s1971_s22  }
 0x2b8 PF: > { %p1872_p13 = scmp.ge.s32.totalorder %s1967_s27, 2  ;;  %s1433_s29 = sand.u32 1, %s1955_s24  }
 0x2b9   : > { %s1434_s8 = scalar_lea.sflag [#allocation3], %s1433_s29 }
 0x2ba   : > { %p1869_p0 = pnand %p1872_p13, %p2054_p6 }
 0x2bc   : > { %p1870_p1 = pneg %p1869_p0 }
 0x2be   : > { %1950 = dma.done.wait (%p1870_p1), %s1434_s8, 4096  }
 0x2bf   : > { %1952 = vsyncadd (%p1870_p1), %s1434_s8, 4294963200  ;;  %p17_p2 = scmp.ge.s32.totalorder %s2037_s30, 4   ;;  %s2442_s24 = smov %s1959_s25 }
 0x2c0   : > { %s2443_s25 = smov %s1963_s26  ;;  %s2444_s26 = smov %s2048_s10 }
 0x2c1   : > { %s2445_s27 = smov %s2037_s30  ;;  %19 = sbr.rel (!%p17_p2) target bundleno = 3 (0x3), region = 83 }
 0x2c6   :  { %1439 = vsyncpa [#allocation3], 1 }
 0x2c7   :  { %1441 = vsyncpa [#allocation3 + $0x1], 1 }

</bundles_post_ra>
